<compile_context>
chip_gen: v6e
topology: v6e:2x2x1
jax: 0.10.0
libtpu: 0.0.40
codegen_flags: <defaults>
</compile_context>

<pallas_src>
import math

import jax
import jax.numpy as jnp
import numpy as np
from jax.experimental import pallas as pl
from jax.experimental.pallas import tpu as pltpu

LOG_2PI = math.log(2.0 * math.pi)


def actor_critic_kernel(
    st_ref, at_ref,                       # (S, tb), (A, tb)
    w1f_ref, b1f_ref,                     # fused actor+critic layer 1: (256, S), (256, 1)
    w2_ref, b2_ref,                       # actor layer 2: (64, 128), (64, 1)
    wm_ref, bm_ref,                       # fused alpha/beta head: (A, 64), (A, 1)
    cw2_ref, cb2_ref,                     # critic layer 2: (64, 128), (64, 1)
    cw3_ref, cb3_ref,                     # critic head: (1, 64), (1, 1)
    inv_var_ref,                          # (A, 1)  == 1 / action_var
    lp_const_ref,                         # (1, 1)  == -0.5*(A*log 2pi + sum(log var))
    out_ref,                              # (2, tb): row 0 logprob, row 1 value
):
    st = st_ref[...]                      # (S, tb)
    at = at_ref[...]                      # (A, tb)

    # ---- shared layer 1 (actor rows 0:128, critic rows 128:256) ----
    h1 = jnp.tanh(
        jnp.dot(w1f_ref[...], st, preferred_element_type=jnp.float32) + b1f_ref[...]
    )                                                                   # (256, tb)
    h1a = h1[:128, :]
    h1c = h1[128:, :]

    # ---- layer 2 (separate, good MXU fill: M=64, K=128, N=tb) ----
    h2a = jnp.tanh(
        jnp.dot(w2_ref[...], h1a, preferred_element_type=jnp.float32) + b2_ref[...]
    )                                                                   # (64, tb)
    h2c = jnp.tanh(
        jnp.dot(cw2_ref[...], h1c, preferred_element_type=jnp.float32) + cb2_ref[...]
    )                                                                   # (64, tb)

    # ---- heads ----
    mean = jnp.dot(wm_ref[...], h2a, preferred_element_type=jnp.float32) + bm_ref[...]   # (A, tb)
    value = jnp.dot(cw3_ref[...], h2c, preferred_element_type=jnp.float32) + cb3_ref[...]  # (1, tb)

    # ---- diagonal MultivariateNormal log_prob (no log / div inside the loop) ----
    diff = at - mean
    maha = jnp.sum(diff * diff * inv_var_ref[...], axis=0, keepdims=True)  # (1, tb)
    logprob = lp_const_ref[...] - 0.5 * maha                               # (1, tb)

    out_ref[...] = jnp.concatenate([logprob, value], axis=0)               # (2, tb)


def _choose_tb(B):
    """Pick a batch tile: lane-aligned, >=2 grid steps when possible."""
    if B <= 256:
        return B                       # single tile; block dims == full array dims
    for tb in (1024, 512, 256, 128):   # prefer grid >= 2 for pipelining / megacore
        if B % tb == 0 and B // tb >= 2:
            return tb
    for tb in (1024, 512, 256, 128):
        if B % tb == 0:
            return tb
    return 512                         # fall back to padding


def actor_critic_evaluate(state, action, params, *, tb=None):
    """Pallas equivalent of ActorCritic.evaluate(state, action)."""
    B, S = state.shape
    A = action.shape[1]

    if tb is None:
        tb = _choose_tb(B)
    Bp = ((B + tb - 1) // tb) * tb          # pad so grid covers whole batch

    # Layout plumbing: batch on lanes. (XLA transpose outside the kernel.)
    st = jnp.asarray(state, jnp.float32).T          # (S, B)
    at = jnp.asarray(action, jnp.float32).T         # (A, B)
    if Bp != B:
        st = jnp.pad(st, ((0, 0), (0, Bp - B)))
        at = jnp.pad(at, ((0, 0), (0, Bp - B)))

    # Hoisted constants (computed once per call, outside the grid loop).
    var = jnp.asarray(params["action_var"], jnp.float32).reshape(A)
    inv_var = (1.0 / var).reshape(A, 1)
    sum_log_var = jnp.sum(jnp.log(var))
    lp_const = (-0.5 * (A * LOG_2PI + sum_log_var)).reshape(1, 1)
    entropy_const = 0.5 * A * (1.0 + LOG_2PI) + 0.5 * sum_log_var

    def full(shape):
        return pl.BlockSpec(shape, lambda i: (0, 0))

    in_specs = [
        pl.BlockSpec((S, tb), lambda i: (0, i)),    # state^T
        pl.BlockSpec((A, tb), lambda i: (0, i)),    # action^T
        full((256, S)), full((256, 1)),             # fused layer 1
        full((64, 128)), full((64, 1)),             # actor layer 2
        full((A, 64)), full((A, 1)),                # fused alpha/beta head
        full((64, 128)), full((64, 1)),             # critic layer 2
        full((1, 64)), full((1, 1)),                # critic head
        full((A, 1)),                               # 1 / action_var
        full((1, 1)),                               # logprob constant
    ]
    out_specs = pl.BlockSpec((2, tb), lambda i: (0, i))
    out_shape = jax.ShapeDtypeStruct((2, Bp), jnp.float32)

    out = pl.pallas_call(
        actor_critic_kernel,
        out_shape=out_shape,
        grid_spec=pltpu.PrefetchScalarGridSpec(
            num_scalar_prefetch=0,
            grid=(Bp // tb,),
            in_specs=in_specs,
            out_specs=out_specs,
        ),
        compiler_params=pltpu.CompilerParams(dimension_semantics=("parallel",)),
    )(
        st, at,
        params["w1f"], params["b1f"],
        params["w2"], params["b2"],
        params["wm"], params["bm"],
        params["cw2"], params["cb2"],
        params["cw3"], params["cb3"],
        inv_var, lp_const,
    )

    logprob = out[0, :B]
    value = out[1, :B]
    # Entropy of a fixed-covariance diagonal Gaussian is input independent.
    entropy = jnp.full((B,), entropy_const, jnp.float32)
    return logprob, value, entropy


def init_params(key, state_dim, action_dim, action_std):
    """Weights in PyTorch (out_features, in_features) orientation, pre-fused."""
    half = action_dim // 2

    def lin(k, fan_out, fan_in):
        # PyTorch nn.Linear default init: U(-1/sqrt(fan_in), 1/sqrt(fan_in))
        kw, kb = jax.random.split(k)
        bound = 1.0 / math.sqrt(fan_in)
        w = jax.random.uniform(kw, (fan_out, fan_in), jnp.float32, -bound, bound)
        b = jax.random.uniform(kb, (fan_out, 1), jnp.float32, -bound, bound)
        return w, b

    ks = jax.random.split(key, 7)
    w1, b1 = lin(ks[0], 128, state_dim)       # affine1
    w2, b2 = lin(ks[1], 64, 128)              # affine2
    wa, ba = lin(ks[2], half, 64)             # alpha_action_mean
    wb, bb = lin(ks[3], half, 64)             # beta_action_mean
    cw1, cb1 = lin(ks[4], 128, state_dim)     # critic[0]
    cw2, cb2 = lin(ks[5], 64, 128)            # critic[2]
    cw3, cb3 = lin(ks[6], 1, 64)              # critic[4]

    return {
        "w1f": jnp.concatenate([w1, cw1], axis=0),   # (256, S): actor | critic layer 1
        "b1f": jnp.concatenate([b1, cb1], axis=0),   # (256, 1)
        "w2": w2, "b2": b2,
        "wm": jnp.concatenate([wa, wb], axis=0),     # (A, 64): mean = cat(alpha, beta)
        "bm": jnp.concatenate([ba, bb], axis=0),     # (A, 1)
        "cw2": cw2, "cb2": cb2,
        "cw3": cw3, "cb3": cb3,
        "action_var": jnp.full((action_dim,), action_std * action_std, jnp.float32),
    }
    # TODO(synk): action_log_std parameter is unused by act()/evaluate() in the
    # reference module, so it is intentionally omitted.


def reference_evaluate(state, action, params):
    """Pure-JAX reference with identical semantics to ActorCritic.evaluate()."""
    w1, cw1 = params["w1f"][:128], params["w1f"][128:]
    b1, cb1 = params["b1f"][:128, 0], params["b1f"][128:, 0]
    x = jnp.tanh(state @ w1.T + b1)
    x = jnp.tanh(x @ params["w2"].T + params["b2"][:, 0])
    mean = x @ params["wm"].T + params["bm"][:, 0]
    var = params["action_var"]
    A = action.shape[1]
    diff = action - mean
    logprob = -0.5 * (jnp.sum(diff * diff / var, axis=1)
                      + A * LOG_2PI + jnp.sum(jnp.log(var)))
    entropy = jnp.full((state.shape[0],),
                       0.5 * A * (1.0 + LOG_2PI) + 0.5 * jnp.sum(jnp.log(var)))
    c = jnp.tanh(state @ cw1.T + cb1)
    c = jnp.tanh(c @ params["cw2"].T + params["cb2"][:, 0])
    value = (c @ params["cw3"].T + params["cb3"][:, 0])[:, 0]
    return logprob, value, entropy


if __name__ == "__main__":
    key = jax.random.PRNGKey(0)
    state_dim, action_dim, action_std = 8, 4, 0.5
    k_params, k_data = jax.random.split(key)
    params = init_params(k_params, state_dim, action_dim, action_std)

    # batch=8: single-tile path; batch=300: padded single tile; batch=1024: 2-step grid.
    for batch in (8, 300, 1024):
        ks, ka = jax.random.split(jax.random.fold_in(k_data, batch))
        state = jax.random.normal(ks, (batch, state_dim), jnp.float32)
        action = jax.random.normal(ka, (batch, action_dim), jnp.float32)

        logprob, value, entropy = actor_critic_evaluate(state, action, params)
        jax.block_until_ready((logprob, value, entropy))

        ref_lp, ref_v, ref_e = reference_evaluate(state, action, params)
        np.testing.assert_allclose(np.asarray(logprob), np.asarray(ref_lp), rtol=1e-4, atol=1e-4)
        np.testing.assert_allclose(np.asarray(value), np.asarray(ref_v), rtol=1e-4, atol=1e-4)
        np.testing.assert_allclose(np.asarray(entropy), np.asarray(ref_e), rtol=1e-4, atol=1e-4)

    print("KERNEL_OK")
</pallas_src>

<mosaic_0001>
module attributes {stable_mosaic.version = 11 : i64} {
  func.func @actor_critic_kernel(%arg0: i32, %arg1: memref<8x8xf32, #tpu.memory_space<vmem>>, %arg2: memref<4x8xf32, #tpu.memory_space<vmem>>, %arg3: memref<256x8xf32, #tpu.memory_space<vmem>>, %arg4: memref<256x1xf32, #tpu.memory_space<vmem>>, %arg5: memref<64x128xf32, #tpu.memory_space<vmem>>, %arg6: memref<64x1xf32, #tpu.memory_space<vmem>>, %arg7: memref<4x64xf32, #tpu.memory_space<vmem>>, %arg8: memref<4x1xf32, #tpu.memory_space<vmem>>, %arg9: memref<64x128xf32, #tpu.memory_space<vmem>>, %arg10: memref<64x1xf32, #tpu.memory_space<vmem>>, %arg11: memref<1x64xf32, #tpu.memory_space<vmem>>, %arg12: memref<1x1xf32, #tpu.memory_space<vmem>>, %arg13: memref<4x1xf32, #tpu.memory_space<vmem>>, %arg14: memref<1x1xf32, #tpu.memory_space<vmem>>, %arg15: memref<2x8xf32, #tpu.memory_space<vmem>>) attributes {dimension_semantics = [#tpu.dimension_semantics<parallel>], iteration_bounds = array<i64: 1>, scalar_prefetch = 0 : i64, scratch_operands = 0 : i64, tpu.core_type = #tpu.core_type<tc>, window_params = [{transform_indices = @transform_0, window_bounds = array<i64: 8, 8>}, {transform_indices = @transform_1, window_bounds = array<i64: 4, 8>}, {pipeline_mode = #tpu.pipeline_mode<synchronous>, transform_indices = @transform_2, window_bounds = array<i64: 256, 8>}, {pipeline_mode = #tpu.pipeline_mode<synchronous>, transform_indices = @transform_3, window_bounds = array<i64: 256, 1>}, {pipeline_mode = #tpu.pipeline_mode<synchronous>, transform_indices = @transform_4, window_bounds = array<i64: 64, 128>}, {pipeline_mode = #tpu.pipeline_mode<synchronous>, transform_indices = @transform_5, window_bounds = array<i64: 64, 1>}, {pipeline_mode = #tpu.pipeline_mode<synchronous>, transform_indices = @transform_6, window_bounds = array<i64: 4, 64>}, {pipeline_mode = #tpu.pipeline_mode<synchronous>, transform_indices = @transform_7, window_bounds = array<i64: 4, 1>}, {pipeline_mode = #tpu.pipeline_mode<synchronous>, transform_indices = @transform_8, window_bounds = array<i64: 64, 128>}, {pipeline_mode = #tpu.pipeline_mode<synchronous>, transform_indices = @transform_9, window_bounds = array<i64: 64, 1>}, {pipeline_mode = #tpu.pipeline_mode<synchronous>, transform_indices = @transform_10, window_bounds = array<i64: 1, 64>}, {pipeline_mode = #tpu.pipeline_mode<synchronous>, transform_indices = @transform_11, window_bounds = array<i64: 1, 1>}, {pipeline_mode = #tpu.pipeline_mode<synchronous>, transform_indices = @transform_12, window_bounds = array<i64: 4, 1>}, {pipeline_mode = #tpu.pipeline_mode<synchronous>, transform_indices = @transform_13, window_bounds = array<i64: 1, 1>}, {transform_indices = @transform_14, window_bounds = array<i64: 2, 8>}]} {
    %c0 = arith.constant 0 : index
    %c0_0 = arith.constant 0 : index
    %0 = vector.load %arg1[%c0, %c0_0] : memref<8x8xf32, #tpu.memory_space<vmem>>, vector<8x8xf32>
    %c0_1 = arith.constant 0 : index
    %c0_2 = arith.constant 0 : index
    %1 = vector.load %arg2[%c0_1, %c0_2] : memref<4x8xf32, #tpu.memory_space<vmem>>, vector<4x8xf32>
    %c0_3 = arith.constant 0 : index
    %c0_4 = arith.constant 0 : index
    %2 = vector.load %arg3[%c0_3, %c0_4] : memref<256x8xf32, #tpu.memory_space<vmem>>, vector<256x8xf32>
    %cst = arith.constant dense<0.000000e+00> : vector<256x8xf32>
    %3 = tpu.matmul %2, %0, %cst {dimension_numbers = #tpu.dot_dimension_numbers<[1], [0], [0], [1], [0, 0, 1, 1], [], []>} : vector<256x8xf32>, vector<8x8xf32>, vector<256x8xf32> -> vector<256x8xf32>
    %c0_5 = arith.constant 0 : index
    %c0_6 = arith.constant 0 : index
    %4 = vector.load %arg4[%c0_5, %c0_6] : memref<256x1xf32, #tpu.memory_space<vmem>>, vector<256x1xf32>
    %5 = vector.broadcast %4 : vector<256x1xf32> to vector<256x8xf32>
    %6 = arith.addf %3, %5 : vector<256x8xf32>
    %7 = math.tanh %6 : vector<256x8xf32>
    %8 = vector.extract_strided_slice %7 {offsets = [0, 0], sizes = [128, 8], strides = [1, 1]} : vector<256x8xf32> to vector<128x8xf32>
    %9 = vector.extract_strided_slice %7 {offsets = [128, 0], sizes = [128, 8], strides = [1, 1]} : vector<256x8xf32> to vector<128x8xf32>
    %c0_7 = arith.constant 0 : index
    %c0_8 = arith.constant 0 : index
    %10 = vector.load %arg5[%c0_7, %c0_8] : memref<64x128xf32, #tpu.memory_space<vmem>>, vector<64x128xf32>
    %cst_9 = arith.constant dense<0.000000e+00> : vector<64x8xf32>
    %11 = tpu.matmul %10, %8, %cst_9 {dimension_numbers = #tpu.dot_dimension_numbers<[1], [0], [0], [1], [0, 0, 1, 1], [], []>} : vector<64x128xf32>, vector<128x8xf32>, vector<64x8xf32> -> vector<64x8xf32>
    %c0_10 = arith.constant 0 : index
    %c0_11 = arith.constant 0 : index
    %12 = vector.load %arg6[%c0_10, %c0_11] : memref<64x1xf32, #tpu.memory_space<vmem>>, vector<64x1xf32>
    %13 = vector.broadcast %12 : vector<64x1xf32> to vector<64x8xf32>
    %14 = arith.addf %11, %13 : vector<64x8xf32>
    %15 = math.tanh %14 : vector<64x8xf32>
    %c0_12 = arith.constant 0 : index
    %c0_13 = arith.constant 0 : index
    %16 = vector.load %arg9[%c0_12, %c0_13] : memref<64x128xf32, #tpu.memory_space<vmem>>, vector<64x128xf32>
    %cst_14 = arith.constant dense<0.000000e+00> : vector<64x8xf32>
    %17 = tpu.matmul %16, %9, %cst_14 {dimension_numbers = #tpu.dot_dimension_numbers<[1], [0], [0], [1], [0, 0, 1, 1], [], []>} : vector<64x128xf32>, vector<128x8xf32>, vector<64x8xf32> -> vector<64x8xf32>
    %c0_15 = arith.constant 0 : index
    %c0_16 = arith.constant 0 : index
    %18 = vector.load %arg10[%c0_15, %c0_16] : memref<64x1xf32, #tpu.memory_space<vmem>>, vector<64x1xf32>
    %19 = vector.broadcast %18 : vector<64x1xf32> to vector<64x8xf32>
    %20 = arith.addf %17, %19 : vector<64x8xf32>
    %21 = math.tanh %20 : vector<64x8xf32>
    %c0_17 = arith.constant 0 : index
    %c0_18 = arith.constant 0 : index
    %22 = vector.load %arg7[%c0_17, %c0_18] : memref<4x64xf32, #tpu.memory_space<vmem>>, vector<4x64xf32>
    %cst_19 = arith.constant dense<0.000000e+00> : vector<4x8xf32>
    %23 = tpu.matmul %22, %15, %cst_19 {dimension_numbers = #tpu.dot_dimension_numbers<[1], [0], [0], [1], [0, 0, 1, 1], [], []>} : vector<4x64xf32>, vector<64x8xf32>, vector<4x8xf32> -> vector<4x8xf32>
    %c0_20 = arith.constant 0 : index
    %c0_21 = arith.constant 0 : index
    %24 = vector.load %arg8[%c0_20, %c0_21] : memref<4x1xf32, #tpu.memory_space<vmem>>, vector<4x1xf32>
    %25 = vector.broadcast %24 : vector<4x1xf32> to vector<4x8xf32>
    %26 = arith.addf %23, %25 : vector<4x8xf32>
    %c0_22 = arith.constant 0 : index
    %c0_23 = arith.constant 0 : index
    %27 = vector.load %arg11[%c0_22, %c0_23] : memref<1x64xf32, #tpu.memory_space<vmem>>, vector<1x64xf32>
    %cst_24 = arith.constant dense<0.000000e+00> : vector<1x8xf32>
    %28 = tpu.matmul %27, %21, %cst_24 {dimension_numbers = #tpu.dot_dimension_numbers<[1], [0], [0], [1], [0, 0, 1, 1], [], []>} : vector<1x64xf32>, vector<64x8xf32>, vector<1x8xf32> -> vector<1x8xf32>
    %c0_25 = arith.constant 0 : index
    %c0_26 = arith.constant 0 : index
    %29 = vector.load %arg12[%c0_25, %c0_26] : memref<1x1xf32, #tpu.memory_space<vmem>>, vector<1x1xf32>
    %30 = vector.broadcast %29 : vector<1x1xf32> to vector<1x8xf32>
    %31 = arith.addf %28, %30 : vector<1x8xf32>
    %32 = arith.subf %1, %26 : vector<4x8xf32>
    %33 = arith.mulf %32, %32 : vector<4x8xf32>
    %c0_27 = arith.constant 0 : index
    %c0_28 = arith.constant 0 : index
    %34 = vector.load %arg13[%c0_27, %c0_28] : memref<4x1xf32, #tpu.memory_space<vmem>>, vector<4x1xf32>
    %35 = vector.broadcast %34 : vector<4x1xf32> to vector<4x8xf32>
    %36 = arith.mulf %33, %35 : vector<4x8xf32>
    %cst_29 = arith.constant dense<0.000000e+00> : vector<8xf32>
    %37 = vector.multi_reduction <add>, %36, %cst_29 [0] : vector<4x8xf32> to vector<8xf32>
    %38 = vector.shape_cast %37 : vector<8xf32> to vector<1x8xf32>
    %c0_30 = arith.constant 0 : index
    %c0_31 = arith.constant 0 : index
    %39 = vector.load %arg14[%c0_30, %c0_31] : memref<1x1xf32, #tpu.memory_space<vmem>>, vector<1x1xf32>
    %cst_32 = arith.constant 5.000000e-01 : f32
    %40 = vector.broadcast %cst_32 : f32 to vector<1x8xf32>
    %41 = arith.mulf %40, %38 : vector<1x8xf32>
    %42 = vector.broadcast %39 : vector<1x1xf32> to vector<1x8xf32>
    %43 = arith.subf %42, %41 : vector<1x8xf32>
    %44 = tpu.concatenate %43, %31 in 0 : vector<1x8xf32>, vector<1x8xf32> -> vector<2x8xf32>
    %c0_33 = arith.constant 0 : index
    %c0_34 = arith.constant 0 : index
    %45 = vector.load %arg15[%c0_33, %c0_34] : memref<2x8xf32, #tpu.memory_space<vmem>>, vector<2x8xf32>
    tpu.vector_store %arg15[%c0_33, %c0_34], %44 {strides = array<i32>} : memref<2x8xf32, #tpu.memory_space<vmem>>, vector<2x8xf32>,
    return
  }
  func.func @transform_0(%arg0: i32) -> (i32, i32) {
    %c0_i32 = arith.constant 0 : i32
    %c0_i32_0 = arith.constant 0 : i32
    return %c0_i32, %arg0 : i32, i32
  }
  func.func @transform_1(%arg0: i32) -> (i32, i32) {
    %c0_i32 = arith.constant 0 : i32
    %c0_i32_0 = arith.constant 0 : i32
    return %c0_i32, %arg0 : i32, i32
  }
  func.func @transform_2(%arg0: i32) -> (i32, i32) {
    %c0_i32 = arith.constant 0 : i32
    %c0_i32_0 = arith.constant 0 : i32
    %c0_i32_1 = arith.constant 0 : i32
    return %c0_i32, %c0_i32_0 : i32, i32
  }
  func.func @transform_3(%arg0: i32) -> (i32, i32) {
    %c0_i32 = arith.constant 0 : i32
    %c0_i32_0 = arith.constant 0 : i32
    %c0_i32_1 = arith.constant 0 : i32
    return %c0_i32, %c0_i32_0 : i32, i32
  }
  func.func @transform_4(%arg0: i32) -> (i32, i32) {
    %c0_i32 = arith.constant 0 : i32
    %c0_i32_0 = arith.constant 0 : i32
    %c0_i32_1 = arith.constant 0 : i32
    return %c0_i32, %c0_i32_0 : i32, i32
  }
  func.func @transform_5(%arg0: i32) -> (i32, i32) {
    %c0_i32 = arith.constant 0 : i32
    %c0_i32_0 = arith.constant 0 : i32
    %c0_i32_1 = arith.constant 0 : i32
    return %c0_i32, %c0_i32_0 : i32, i32
  }
  func.func @transform_6(%arg0: i32) -> (i32, i32) {
    %c0_i32 = arith.constant 0 : i32
    %c0_i32_0 = arith.constant 0 : i32
    %c0_i32_1 = arith.constant 0 : i32
    return %c0_i32, %c0_i32_0 : i32, i32
  }
  func.func @transform_7(%arg0: i32) -> (i32, i32) {
    %c0_i32 = arith.constant 0 : i32
    %c0_i32_0 = arith.constant 0 : i32
    %c0_i32_1 = arith.constant 0 : i32
    return %c0_i32, %c0_i32_0 : i32, i32
  }
  func.func @transform_8(%arg0: i32) -> (i32, i32) {
    %c0_i32 = arith.constant 0 : i32
    %c0_i32_0 = arith.constant 0 : i32
    %c0_i32_1 = arith.constant 0 : i32
    return %c0_i32, %c0_i32_0 : i32, i32
  }
  func.func @transform_9(%arg0: i32) -> (i32, i32) {
    %c0_i32 = arith.constant 0 : i32
    %c0_i32_0 = arith.constant 0 : i32
    %c0_i32_1 = arith.constant 0 : i32
    return %c0_i32, %c0_i32_0 : i32, i32
  }
  func.func @transform_10(%arg0: i32) -> (i32, i32) {
    %c0_i32 = arith.constant 0 : i32
    %c0_i32_0 = arith.constant 0 : i32
    %c0_i32_1 = arith.constant 0 : i32
    return %c0_i32, %c0_i32_0 : i32, i32
  }
  func.func @transform_11(%arg0: i32) -> (i32, i32) {
    %c0_i32 = arith.constant 0 : i32
    %c0_i32_0 = arith.constant 0 : i32
    %c0_i32_1 = arith.constant 0 : i32
    return %c0_i32, %c0_i32_0 : i32, i32
  }
  func.func @transform_12(%arg0: i32) -> (i32, i32) {
    %c0_i32 = arith.constant 0 : i32
    %c0_i32_0 = arith.constant 0 : i32
    %c0_i32_1 = arith.constant 0 : i32
    return %c0_i32, %c0_i32_0 : i32, i32
  }
  func.func @transform_13(%arg0: i32) -> (i32, i32) {
    %c0_i32 = arith.constant 0 : i32
    %c0_i32_0 = arith.constant 0 : i32
    %c0_i32_1 = arith.constant 0 : i32
    return %c0_i32, %c0_i32_0 : i32, i32
  }
  func.func @transform_14(%arg0: i32) -> (i32, i32) {
    %c0_i32 = arith.constant 0 : i32
    %c0_i32_0 = arith.constant 0 : i32
    return %c0_i32, %arg0 : i32, i32
  }
}

</mosaic_0001>

<bundles_post_ra>
// kernel: tpu_custom_call.1
= control target key start
LH: loop header
LB: loop body
LE: loop exit
PB: predicated region body
PF: predicated region fallthrough
CT: control target
= control target key end

     0   :  { %s2106_s0 = inlined_call_operand.vmem [shape: f32[8,8], index: 0, kind: input, shape index: {}]   ;;  %s2107_s1 = inlined_call_operand.vmem [shape: f32[4,8], index: 1, kind: input, shape index: {}]   ;;  %s2108_s2 = inlined_call_operand.vmem [shape: f32[256,8], index: 2, kind: input, shape index: {}]   ;;  %s2109_s3 = inlined_call_operand.vmem [shape: f32[256,1], index: 3, kind: input, shape index: {}]   ;;  %s2110_s4 = inlined_call_operand.vmem [shape: f32[64,128], index: 4, kind: input, shape index: {}]   ;;  %s2111_s5 = inlined_call_operand.vmem [shape: f32[64,1], index: 5, kind: input, shape index: {}]   ;;  %s2112_s6 = inlined_call_operand.vmem [shape: f32[4,64], index: 6, kind: input, shape index: {}]   ;;  %s2113_s7 = inlined_call_operand.vmem [shape: f32[4,1], index: 7, kind: input, shape index: {}]   ;;  %s2114_s8 = inlined_call_operand.vmem [shape: f32[64,128], index: 8, kind: input, shape index: {}]   ;;  %s2115_s9 = inlined_call_operand.vmem [shape: f32[64,1], index: 9, kind: input, shape index: {}]   ;;  %s2116_s10 = inlined_call_operand.vmem [shape: f32[1,64], index: 10, kind: input, shape index: {}]   ;;  %s2117_s11 = inlined_call_operand.<no memory space> [shape: f32[1,1], index: 11, kind: input, shape index: {}]   ;;  %s2118_s12 = inlined_call_operand.vmem [shape: f32[4,1], index: 12, kind: input, shape index: {}]   ;;  %s2119_s14 = inlined_call_operand.hbm [shape: f32[2,8], index: 14, kind: output, shape index: {}]   ;;  %s2120_s13 = inlined_call_operand.<no memory space> [shape: f32[1,1], index: 13, kind: input, shape index: {}]  }
   0x1   :  { %v19_v0 = vstv %s2117_s11  ;;  %v21_v1 = vstv %s2120_s13 }
   0x2   :  { %20 = vst [vmem:[#allocation2] sm:$0x1] %v19_v0  ;;  %22 = vst [vmem:[#allocation3] sm:$0x1] %v21_v1 }
   0x3   :  { %v52_v2 = vld [vmem:[%s2106_s0] sm:$0xff]  ;;  %v101_v3 = vld [vmem:[%s2109_s3 + $0x78] sm:$0xff]  ;;  %v99_v4 = vld [vmem:[%s2109_s3 + $0x68] sm:$0xff]  ;;  %v1618_v5 = vmov 0   ;;  %vm278_vm0 = vcmask 64512  }
   0x4   :  { %1499 = vset.pattern.permute.xlu1 %v1618_v5  ;;  %1498 = vset.pattern.permute.xlu0 %v1618_v5  ;;  %v54_v6 = vld [vmem:[%s2108_s2] sm:$0xff]  ;;  %v55_v7 = vld [vmem:[%s2108_s2 + $0x8] sm:$0xff]  ;;  %v100_v8 = vld [vmem:[%s2109_s3 + $0x70] sm:$0xff] }
   0x5   :  { %1318 = vmatprep.subr.mxu0 %v52_v2  ;;  %195 = vperm.xlu0 %1498, %v101_v3   ;;  %v56_v9 = vld [vmem:[%s2108_s2 + $0x10] sm:$0xff]  ;;  %v98_v10 = vld [vmem:[%s2109_s3 + $0x60] sm:$0xff]  ;;  %v57_v11 = vld [vmem:[%s2108_s2 + $0x18] sm:$0xff] }
   0x6   :  { %185 = vperm.xlu1 %1499, %v99_v4   ;;  %1319 = vmatpush3.msra.mxu0 %v52_v2  ;;  %v97_v12 = vld [vmem:[%s2109_s3 + $0x58] sm:$0xff]  ;;  %v58_v13 = vld [vmem:[%s2108_s2 + $0x20] sm:$0xff]  ;;  %v96_v14 = vld [vmem:[%s2109_s3 + $0x50] sm:$0xff] }
   0x7   :  { %1320 = vmatprep.mubr.msk.f32.mxu0 %vm278_vm0, %v54_v6  ;;  %v59_v15 = vld [vmem:[%s2108_s2 + $0x28] sm:$0xff]  ;;  %v60_v17 = vld [vmem:[%s2108_s2 + $0x30] sm:$0xff]  ;;  %v94_v18 = vld [vmem:[%s2109_s3 + $0x40] sm:$0xff] }
   0x8   :  { %1321 = vmatmul.mubr.msk.f32.vlgmr.msra.gmra.mxu0 %vm278_vm0, %v55_v7  ;;  %v95_v16 = vld [vmem:[%s2109_s3 + $0x48] sm:$0xff]  ;;  %v61_v19 = vld [vmem:[%s2108_s2 + $0x38] sm:$0xff]  ;;  %v62_v21 = vld [vmem:[%s2108_s2 + $0x40] sm:$0xff] }
   0x9   :  { %190 = vperm.xlu0 %1498, %v100_v8   ;;  %1323 = vmatprep.mubr.msk.f32.mxu0 %vm278_vm0, %v56_v9  ;;  %v93_v20 = vld [vmem:[%s2109_s3 + $0x38] sm:$0xff]  ;;  %v92_v22 = vld [vmem:[%s2109_s3 + $0x30] sm:$0xff]  ;;  %v63_v23 = vld [vmem:[%s2108_s2 + $0x48] sm:$0xff] }
   0xa   :  { %180 = vperm.xlu1 %1499, %v98_v10   ;;  %v91_v24 = vld [vmem:[%s2109_s3 + $0x28] sm:$0xff]  ;;  %v64_v25 = vld [vmem:[%s2108_s2 + $0x50] sm:$0xff]  ;;  %v90_v26 = vld [vmem:[%s2109_s3 + $0x20] sm:$0xff] }
   0xb   :  { %v65_v27 = vld [vmem:[%s2108_s2 + $0x58] sm:$0xff]  ;;  %v66_v29 = vld [vmem:[%s2108_s2 + $0x60] sm:$0xff]  ;;  %v88_v30 = vld [vmem:[%s2109_s3 + $0x10] sm:$0xff] }
   0xc   :  { %1324 = vmatmul.mubr.msk.f32.gmra.mxu0 %vm278_vm0, %v57_v11  ;;  %v89_v28 = vld [vmem:[%s2109_s3 + $0x18] sm:$0xff]  ;;  %v67_v31 = vld [vmem:[%s2108_s2 + $0x68] sm:$0xff]  ;;  %v68_v33 = vld [vmem:[%s2108_s2 + $0x70] sm:$0xff] }
   0xd   :  { %175 = vperm.xlu0 %1498, %v97_v12   ;;  %1326 = vmatprep.mubr.msk.f32.mxu0 %vm278_vm0, %v58_v13  ;;  %v87_v32 = vld [vmem:[%s2109_s3 + $0x8] sm:$0xff]  ;;  %v86_v34 = vld [vmem:[%s2109_s3] sm:$0xff] }
   0xe   :  { %170 = vperm.xlu1 %1499, %v96_v14  }
  0x10   :  { %1327 = vmatmul.mubr.msk.f32.gmra.mxu0 %vm278_vm0, %v59_v15 }
  0x11   :  { %165 = vperm.xlu0 %1498, %v95_v16   ;;  %1329 = vmatprep.mubr.msk.f32.mxu0 %vm278_vm0, %v60_v17 }
  0x12   :  { %160 = vperm.xlu1 %1499, %v94_v18  }
  0x14   :  { %1330 = vmatmul.mubr.msk.f32.gmra.mxu0 %vm278_vm0, %v61_v19 }
  0x15   :  { %155 = vperm.xlu0 %1498, %v93_v20   ;;  %1332 = vmatprep.mubr.msk.f32.mxu0 %vm278_vm0, %v62_v21 }
  0x16   :  { %150 = vperm.xlu1 %1499, %v92_v22  }
  0x18   :  { %1333 = vmatmul.mubr.msk.f32.gmra.mxu0 %vm278_vm0, %v63_v23 }
  0x19   :  { %145 = vperm.xlu0 %1498, %v91_v24   ;;  %1335 = vmatprep.mubr.msk.f32.mxu0 %vm278_vm0, %v64_v25 }
  0x1a   :  { %140 = vperm.xlu1 %1499, %v90_v26  }
  0x1c   :  { %1336 = vmatmul.mubr.msk.f32.gmra.mxu0 %vm278_vm0, %v65_v27 }
  0x1d   :  { %135 = vperm.xlu0 %1498, %v89_v28   ;;  %1338 = vmatprep.mubr.msk.f32.mxu0 %vm278_vm0, %v66_v29 }
  0x1e   :  { %130 = vperm.xlu1 %1499, %v88_v30  }
  0x1f   :  { %23 = vsyncpa [#allocation5], 0  ;;  %v69_v35 = vld [vmem:[%s2108_s2 + $0x78] sm:$0xff]  ;;  %v70_v37 = vld [vmem:[%s2108_s2 + $0x80] sm:$0xff]  ;;  %vm1620_vm1 = vmmov 0   ;;  %vm977_vm2 = vcmask 523264  }
  0x20   :  { %1339 = vmatmul.mubr.msk.f32.gmra.mxu0 %vm278_vm0, %v67_v31  ;;  %v117_v36 = vld [vmem:[%s2109_s3 + $0xf8] sm:$0xff]  ;;  %v116_v38 = vld [vmem:[%s2109_s3 + $0xf0] sm:$0xff]  ;;  %v71_v39 = vld [vmem:[%s2108_s2 + $0x88] sm:$0xff]  ;;  %vm1144_vm3 = vcmask 60416   ;;  %vm1167_vm4 = vcmask 1040384   ;;  %vm1169_vm5 = vcmask 58368  }
  0x21   :  { %125 = vperm.xlu0 %1498, %v87_v32   ;;  %1341 = vmatprep.mubr.msk.f32.mxu0 %vm278_vm0, %v68_v33  ;;  %v115_v40 = vld [vmem:[%s2109_s3 + $0xe8] sm:$0xff]  ;;  %v72_v41 = vld [vmem:[%s2108_s2 + $0x90] sm:$0xff]  ;;  %v114_v42 = vld [vmem:[%s2109_s3 + $0xe0] sm:$0xff] }
  0x22   :  { %120 = vperm.xlu1 %1499, %v86_v34   ;;  %v73_v43 = vld [vmem:[%s2108_s2 + $0x98] sm:$0xff]  ;;  %v74_v45 = vld [vmem:[%s2108_s2 + $0xa0] sm:$0xff]  ;;  %v112_v46 = vld [vmem:[%s2109_s3 + $0xd0] sm:$0xff] }
  0x23   :  { %v113_v44 = vld [vmem:[%s2109_s3 + $0xd8] sm:$0xff]  ;;  %v75_v47 = vld [vmem:[%s2108_s2 + $0xa8] sm:$0xff]  ;;  %v76_v49 = vld [vmem:[%s2108_s2 + $0xb0] sm:$0xff] }
  0x24   :  { %1342 = vmatmul.mubr.msk.f32.gmra.mxu0 %vm278_vm0, %v69_v35  ;;  %v111_v48 = vld [vmem:[%s2109_s3 + $0xc8] sm:$0xff]  ;;  %v110_v50 = vld [vmem:[%s2109_s3 + $0xc0] sm:$0xff]  ;;  %v77_v51 = vld [vmem:[%s2108_s2 + $0xb8] sm:$0xff] }
  0x25   :  { %275 = vperm.xlu0 %1498, %v117_v36   ;;  %1344 = vmatprep.mubr.msk.f32.mxu0 %vm278_vm0, %v70_v37  ;;  %v109_v52 = vld [vmem:[%s2109_s3 + $0xb8] sm:$0xff]  ;;  %v78_v53 = vld [vmem:[%s2108_s2 + $0xc0] sm:$0xff]  ;;  %v108_v54 = vld [vmem:[%s2109_s3 + $0xb0] sm:$0xff] }
  0x26   :  { %270 = vperm.xlu1 %1499, %v116_v38   ;;  %v79_v55 = vld [vmem:[%s2108_s2 + $0xc8] sm:$0xff]  ;;  %v80_v57 = vld [vmem:[%s2108_s2 + $0xd0] sm:$0xff]  ;;  %v106_v58 = vld [vmem:[%s2109_s3 + $0xa0] sm:$0xff] }
  0x27   :  { %v107_v56 = vld [vmem:[%s2109_s3 + $0xa8] sm:$0xff]  ;;  %v81_v59 = vld [vmem:[%s2108_s2 + $0xd8] sm:$0xff]  ;;  %v82_v61 = vld [vmem:[%s2108_s2 + $0xe0] sm:$0xff] }
  0x28   :  { %1345 = vmatmul.mubr.msk.f32.gmra.mxu0 %vm278_vm0, %v71_v39  ;;  %v105_v60 = vld [vmem:[%s2109_s3 + $0x98] sm:$0xff]  ;;  %v104_v62 = vld [vmem:[%s2109_s3 + $0x90] sm:$0xff]  ;;  %v83_v63 = vld [vmem:[%s2108_s2 + $0xe8] sm:$0xff] }
  0x29   :  { %265 = vperm.xlu0 %1498, %v115_v40   ;;  %1347 = vmatprep.mubr.msk.f32.mxu0 %vm278_vm0, %v72_v41  ;;  %v103_v0 = vld [vmem:[%s2109_s3 + $0x88] sm:$0xff]  ;;  %v84_v1 = vld [vmem:[%s2108_s2 + $0xf0] sm:$0xff]  ;;  %v102_v2 = vld [vmem:[%s2109_s3 + $0x80] sm:$0xff] }
  0x2a   :  { %260 = vperm.xlu1 %1499, %v114_v42   ;;  %v85_v3 = vld [vmem:[%s2108_s2 + $0xf8] sm:$0xff]  ;;  %v646_v5 = vld [vmem:[%s2111_s5 + $0x30] sm:$0xff]  ;;  %v645_v6 = vld [vmem:[%s2111_s5 + $0x28] sm:$0xff] }
  0x2b   :  { %v647_v4 = vld [vmem:[%s2111_s5 + $0x38] sm:$0xff]  ;;  %v644_v7 = vld [vmem:[%s2111_s5 + $0x20] sm:$0xff]  ;;  %v642_v9 = vld [vmem:[%s2111_s5 + $0x10] sm:$0xff] }
  0x2c   :  { %1348 = vmatmul.mubr.msk.f32.gmra.mxu0 %vm278_vm0, %v73_v43  ;;  %v643_v8 = vld [vmem:[%s2111_s5 + $0x18] sm:$0xff]  ;;  %v641_v10 = vld [vmem:[%s2111_s5 + $0x8] sm:$0xff]  ;;  %v640_v11 = vld [vmem:[%s2111_s5] sm:$0xff] }
  0x2d   :  { %255 = vperm.xlu0 %1498, %v113_v44   ;;  %1350 = vmatprep.mubr.msk.f32.mxu0 %vm278_vm0, %v74_v45  ;;  %v816_v12 = vld [vmem:[%s2115_s9 + $0x38] sm:$0xff]  ;;  %v815_v13 = vld [vmem:[%s2115_s9 + $0x30] sm:$0xff]  ;;  %v814_v14 = vld [vmem:[%s2115_s9 + $0x28] sm:$0xff] }
  0x2e   :  { %250 = vperm.xlu1 %1499, %v112_v46   ;;  %v813_v15 = vld [vmem:[%s2115_s9 + $0x20] sm:$0xff]  ;;  %v812_v16 = vld [vmem:[%s2115_s9 + $0x18] sm:$0xff]  ;;  %v811_v17 = vld [vmem:[%s2115_s9 + $0x10] sm:$0xff] }
  0x2f   :  { %v810_v18 = vld [vmem:[%s2115_s9 + $0x8] sm:$0xff]  ;;  %v809_v19 = vld [vmem:[%s2115_s9] sm:$0xff] }
  0x30   :  { %1351 = vmatmul.mubr.msk.f32.gmra.mxu0 %vm278_vm0, %v75_v47  ;;  %v971_v20 = vld [vmem:[%s2113_s7] sm:$0xf] }
  0x31   :  { %245 = vperm.xlu0 %1498, %v111_v48   ;;  %1353 = vmatprep.mubr.msk.f32.mxu0 %vm278_vm0, %v76_v49  ;;  %v1137_v21 = vld [vmem:[%s2118_s12] sm:$0xf] }
  0x32   :  { %240 = vperm.xlu1 %1499, %v110_v50   ;;  %v1052_v22 = vld [vmem:[#allocation2] sm:$0x1]  ;;  %v1152_v23 = vld [vmem:[#allocation3] sm:$0x1] }
  0x33   :  { %v632_v24 = vld [vmem:[%s2110_s4] sm:$0xff] }
  0x34   :  { %1354 = vmatmul.mubr.msk.f32.gmra.mxu0 %vm278_vm0, %v77_v51  ;;  %1400 = vmatprep.mubr.f32.mxu1 %v632_v24 }
  0x35   :  { %235 = vperm.xlu0 %1498, %v109_v52   ;;  %1356 = vmatprep.mubr.msk.f32.mxu0 %vm278_vm0, %v78_v53 }
  0x36   :  { %230 = vperm.xlu1 %1499, %v108_v54  }
  0x38   :  { %1357 = vmatmul.mubr.msk.f32.gmra.mxu0 %vm278_vm0, %v79_v55 }
  0x39   :  { %225 = vperm.xlu0 %1498, %v107_v56   ;;  %1359 = vmatprep.mubr.msk.f32.mxu0 %vm278_vm0, %v80_v57 }
  0x3a   :  { %220 = vperm.xlu1 %1499, %v106_v58  }
  0x3c   :  { %1360 = vmatmul.mubr.msk.f32.gmra.mxu0 %vm278_vm0, %v81_v59 }
  0x3d   :  { %215 = vperm.xlu0 %1498, %v105_v60   ;;  %1362 = vmatprep.mubr.msk.f32.mxu0 %vm278_vm0, %v82_v61 }
  0x3e   :  { %210 = vperm.xlu1 %1499, %v104_v62  }
  0x40   :  { %1363 = vmatmul.mubr.msk.f32.gmra.mxu0 %vm278_vm0, %v83_v63 }
  0x41   :  { %205 = vperm.xlu0 %1498, %v103_v0   ;;  %1365 = vmatprep.mubr.msk.f32.mxu0 %vm278_vm0, %v84_v1 }
  0x42   :  { %200 = vperm.xlu1 %1499, %v102_v2  }
  0x44   :  { %1366 = vmatmul.mubr.msk.f32.gmra.mxu0 %vm278_vm0, %v85_v3 }
  0x45   :  { %685 = vperm.xlu0 %1498, %v647_v4  }
  0x46   :  { %680 = vperm.xlu1 %1499, %v646_v5  }
  0x49   :  { %675 = vperm.xlu0 %1498, %v645_v6  }
  0x4a   :  { %670 = vperm.xlu1 %1499, %v644_v7  }
  0x4d   :  { %665 = vperm.xlu0 %1498, %v643_v8  }
  0x4e   :  { %660 = vperm.xlu1 %1499, %v642_v9  }
  0x51   :  { %655 = vperm.xlu0 %1498, %v641_v10  }
  0x52   :  { %650 = vperm.xlu1 %1499, %v640_v11  }
  0x55   :  { %854 = vperm.xlu0 %1498, %v816_v12  }
  0x56   :  { %849 = vperm.xlu1 %1499, %v815_v13  }
  0x59   :  { %844 = vperm.xlu0 %1498, %v814_v14  }
  0x5a   :  { %839 = vperm.xlu1 %1499, %v813_v15  }
  0x5d   :  { %834 = vperm.xlu0 %1498, %v812_v16  }
  0x5e   :  { %829 = vperm.xlu1 %1499, %v811_v17  }
  0x61   :  { %824 = vperm.xlu0 %1498, %v810_v18  }
  0x62   :  { %819 = vperm.xlu1 %1499, %v809_v19  }
  0x65   :  { %974 = vperm.xlu0 %1498, %v971_v20  }
  0x66   :  { %1140 = vperm.xlu1 %1499, %v1137_v21  }
  0x69   :  { %1055 = vperm.xlu0 %1498, %v1052_v22  }
  0x6a   :  { %1156 = vperm.xlu1 %1499, %v1152_v23  }
  0x80   :  { %v196_v25 = vpop.permute.xlu0 %195 }
  0x81   :  { %v186_v26 = vpop.permute.xlu1 %185 }
  0x84   :  { %v191_v28 = vpop.permute.xlu0 %190 }
  0x85   :  { %v181_v30 = vpop.permute.xlu1 %180 }
  0x88   :  { %v176_v33 = vpop.permute.xlu0 %175 }
  0x89   :  { %v171_v35 = vpop.permute.xlu1 %170 }
  0x8c   :  { %v166_v38 = vpop.permute.xlu0 %165 }
  0x8d   :  { %v161_v40 = vpop.permute.xlu1 %160 }
  0x90   :  { %v156_v43 = vpop.permute.xlu0 %155 }
  0x91   :  { %v151_v45 = vpop.permute.xlu1 %150 }
  0x94   :  { %v146_v48 = vpop.permute.xlu0 %145 }
  0x95   :  { %v141_v50 = vpop.permute.xlu1 %140 }
  0x98   :  { %v136_v56 = vpop.permute.xlu0 %135 }
  0x99   :  { %v131_v59 = vpop.permute.xlu1 %130 }
  0x9c   :  { %v126_v0 = vpop.permute.xlu0 %125 }
  0x9d   :  { %v121_v3 = vpop.permute.xlu1 %120 }
  0xa0   :  { %v276_v9 = vpop.permute.xlu0 %275 }
  0xa1   :  { %v271_v13 = vpop.permute.xlu1 %270 }
  0xa4   :  { %v266_v20 = vpop.permute.xlu0 %265 }
  0xa5   :  { %v261_v24 = vpop.permute.xlu1 %260 }
  0xc8   :  { %v1987_v27 = vpop.f32.mrf.mxu0 }
  0xca   :  { %v1989_v29 = vpop.f32.mrf.mxu0 }
  0xcc   :  { %v1991_v31 = vpop.f32.mrf.mxu0 }
  0xcd   :  { %v457_v22 = vadd.f32 %v1991_v31, %v136_v56 }
  0xce   :  { %v1993_v32 = vpop.f32.mrf.mxu0 }
  0xd0   :  { %v1328_v34 = vpop.f32.mrf.mxu0 }
  0xd1   :  { %v467_v15 = vadd.f32 %v1328_v34, %v146_v48 }
  0xd2   :  { %v461_v36 = vpop.f32.mrf.mxu0 }
  0xd3   :  { %v462_v18 = vadd.f32 %v461_v36, %v141_v50  ;;  %v442_v36 = vadd.f32 %v1989_v29, %v121_v3 }
  0xd4   :  { %v1331_v37 = vpop.f32.mrf.mxu0 }
  0xd5   :  { %v477_v7 = vadd.f32 %v1331_v37, %v156_v43 }
  0xd6   :  { %v471_v39 = vpop.f32.mrf.mxu0 }
  0xd7   :  { %v472_v11 = vadd.f32 %v471_v39, %v151_v45 }
  0xd8   :  { %v1334_v41 = vpop.f32.mrf.mxu0 }
  0xd9   :  { %v487_v2 = vadd.f32 %v1334_v41, %v166_v38  ;;  %v251_v38 = vpop.permute.xlu1 %250 }
  0xda   :  { %v481_v42 = vpop.f32.mrf.mxu0 }
  0xdb   :  { %v482_v5 = vadd.f32 %v481_v42, %v161_v40 }
  0xdc   :  { %v1337_v44 = vpop.f32.mrf.mxu0 }
  0xdd   :  { %v497_v61 = vadd.f32 %v1337_v44, %v176_v33  ;;  %v447_v33 = vadd.f32 %v1987_v27, %v126_v0 }
  0xde   :  { %v491_v46 = vpop.f32.mrf.mxu0 }
  0xdf   :  { %v492_v63 = vadd.f32 %v491_v46, %v171_v35  ;;  %v256_v35 = vpop.permute.xlu0 %255  ;;  %v241_v46 = vpop.permute.xlu1 %240 }
  0xe0   :  { %v1340_v47 = vpop.f32.mrf.mxu0 }
  0xe1   :  { %v507_v54 = vadd.f32 %v1340_v47, %v186_v26  ;;  %v452_v26 = vadd.f32 %v1993_v32, %v131_v59 }
  0xe2   :  { %v501_v49 = vpop.f32.mrf.mxu0 }
  0xe3   :  { %v502_v58 = vadd.f32 %v501_v49, %v181_v30  ;;  %v246_v42 = vpop.permute.xlu0 %245 }
  0xe4   :  { %v1343_v51 = vpop.f32.mrf.mxu0 }
  0xe5   :  { %v517_v52 = vadd.f32 %v1343_v51, %v196_v25 }
  0xe6   :  { %v511_v53 = vpop.f32.mrf.mxu0 }
  0xe7   :  { %1500 = vtanh.f32 %v517_v52  ;;  %v512_v55 = vadd.f32 %v511_v53, %v191_v28  ;;  %v236_v51 = vpop.permute.xlu0 %235 }
  0xe8   :  { %v1995_v57 = vpop.f32.mrf.mxu0 }
  0xe9   :  { %1502 = vtanh.f32 %v512_v55 }
  0xea   :  { %v1997_v60 = vpop.f32.mrf.mxu0  ;;  %1504 = vtanh.f32 %v507_v54  ;;  %v231_v54 = vpop.permute.xlu1 %230 }
  0xeb   :  { %1506 = vtanh.f32 %v502_v58 }
  0xec   :  { %v1999_v62 = vpop.f32.mrf.mxu0  ;;  %1508 = vtanh.f32 %v497_v61  ;;  %v226_v61 = vpop.permute.xlu0 %225 }
  0xed   :  { %1510 = vtanh.f32 %v492_v63  ;;  %v633_v63 = vld [vmem:[%s2110_s4 + $0x8] sm:$0xff] }
  0xee   :  { %v2001_v1 = vpop.f32.mrf.mxu0  ;;  %1512 = vtanh.f32 %v487_v2  ;;  %v634_v2 = vld [vmem:[%s2110_s4 + $0x10] sm:$0xff] }
  0xef   :  { %1514 = vtanh.f32 %v482_v5  ;;  %v221_v5 = vpop.permute.xlu1 %220 }
  0xf0   :  { %v2003_v4 = vpop.f32.mrf.mxu0  ;;  %1516 = vtanh.f32 %v477_v7 }
  0xf1   :  { %1518 = vtanh.f32 %v472_v11  ;;  %v636_v11 = vld [vmem:[%s2110_s4 + $0x20] sm:$0xff] }
  0xf2   :  { %v2005_v6 = vpop.f32.mrf.mxu0  ;;  %1520 = vtanh.f32 %v467_v15 }
  0xf3   :  { %1522 = vtanh.f32 %v462_v18  ;;  %v638_v18 = vld [vmem:[%s2110_s4 + $0x30] sm:$0xff] }
  0xf4   :  { %v1501_v8 = vpop.eup %1500  ;;  %v2007_v10 = vpop.f32.mrf.mxu0  ;;  %1524 = vtanh.f32 %v457_v22 }
  0xf5   :  { %1368 = vmatprep.subr.mxu1 %v1501_v8  ;;  %1526 = vtanh.f32 %v452_v26  ;;  %v557_v0 = vadd.f32 %v2007_v10, %v236_v51  ;;  %v547_v10 = vadd.f32 %v2003_v4, %v226_v61  ;;  %v637_v4 = vld [vmem:[%s2110_s4 + $0x28] sm:$0xff] }
  0xf6   :  { %v1503_v12 = vpop.eup %1502  ;;  %v2009_v14 = vpop.f32.mrf.mxu0  ;;  %1369 = vmatpush3.msra.mxu1 %v1501_v8  ;;  %1528 = vtanh.f32 %v447_v33 }
  0xf7   :  { %1370 = vmatprep.subr.mxu1 %v1503_v12  ;;  %v1505_v16 = vpop.eup %1504  ;;  %1530 = vtanh.f32 %v442_v36  ;;  %v552_v7 = vadd.f32 %v2009_v14, %v231_v54  ;;  %v542_v14 = vadd.f32 %v2005_v6, %v221_v5  ;;  %v802_v36 = vld [vmem:[%s2114_s8 + $0x8] sm:$0xff] }
  0xf8   :  { %v2011_v17 = vpop.f32.mrf.mxu0  ;;  %1371 = vmatpush3.msra.mxu1 %v1503_v12  ;;  %v1507_v19 = vpop.eup %1506 }
  0xf9   :  { %1372 = vmatprep.subr.mxu1 %v1505_v16  ;;  %v1509_v23 = vpop.eup %1508  ;;  %v567_v55 = vadd.f32 %v2011_v17, %v246_v42 }
  0xfa   :  { %v2013_v21 = vpop.f32.mrf.mxu0  ;;  %1373 = vmatpush3.msra.mxu1 %v1505_v16  ;;  %v1511_v28 = vpop.eup %1510 }
  0xfb   :  { %1374 = vmatprep.subr.mxu1 %v1507_v19  ;;  %v1513_v34 = vpop.eup %1512  ;;  %v562_v58 = vadd.f32 %v2013_v21, %v241_v46  ;;  %v211_v16 = vpop.permute.xlu1 %210 }
  0xfc   :  { %v1361_v25 = vpop.f32.mrf.mxu0  ;;  %1375 = vmatpush3.msra.mxu1 %v1507_v19  ;;  %v1515_v37 = vpop.eup %1514  ;;  %v532_v19 = vadd.f32 %v2001_v1, %v211_v16 }
  0xfd   :  { %1376 = vmatprep.subr.mxu1 %v1509_v23  ;;  %v1517_v39 = vpop.eup %1516  ;;  %v577_v49 = vadd.f32 %v1361_v25, %v256_v35 }
  0xfe   :  { %v571_v30 = vpop.f32.mrf.mxu0  ;;  %1377 = vmatpush3.msra.mxu1 %v1509_v23  ;;  %v1519_v41 = vpop.eup %1518  ;;  %v801_v23 = vld [vmem:[%s2114_s8] sm:$0xff] }
  0xff   :  { %1378 = vmatprep.subr.mxu1 %v1511_v28  ;;  %v1521_v45 = vpop.eup %1520  ;;  %v572_v52 = vadd.f32 %v571_v30, %v251_v38  ;;  %v804_v38 = vld [vmem:[%s2114_s8 + $0x18] sm:$0xff] }
 0x100   :  { %v1364_v31 = vpop.f32.mrf.mxu0  ;;  %1379 = vmatpush3.msra.mxu1 %v1511_v28  ;;  %v1523_v48 = vpop.eup %1522 }
 0x101   :  { %1380 = vmatprep.subr.mxu1 %v1513_v34  ;;  %v587_v44 = vadd.f32 %v1364_v31, %v266_v20  ;;  %v1525_v50 = vpop.eup %1524 }
 0x102   :  { %v581_v32 = vpop.f32.mrf.mxu0  ;;  %1381 = vmatpush3.msra.mxu1 %v1513_v34  ;;  %v1527_v53 = vpop.eup %1526 }
 0x103   :  { %1382 = vmatprep.subr.mxu1 %v1515_v37  ;;  %v582_v47 = vadd.f32 %v581_v32, %v261_v24  ;;  %v1529_v56 = vpop.eup %1528  ;;  %v201_v24 = vpop.permute.xlu1 %200  ;;  %v805_v32 = vld [vmem:[%s2114_s8 + $0x20] sm:$0xff] }
 0x104   :  { %v1367_v40 = vpop.f32.mrf.mxu0  ;;  %1383 = vmatpush3.msra.mxu1 %v1515_v37  ;;  %v1531_v59 = vpop.eup %1530  ;;  %v522_v25 = vadd.f32 %v1997_v60, %v201_v24  ;;  %v803_v37 = vld [vmem:[%s2114_s8 + $0x10] sm:$0xff] }
 0x105   :  { %v597_v27 = vadd.f32 %v1367_v40, %v276_v9  ;;  %1384 = vmatprep.subr.mxu1 %v1517_v39  ;;  %v635_v9 = vld [vmem:[%s2110_s4 + $0x18] sm:$0xff]  ;;  %v807_v40 = vld [vmem:[%s2114_s8 + $0x30] sm:$0xff] }
 0x106   :  { %v591_v43 = vpop.f32.mrf.mxu0  ;;  %1385 = vmatpush3.msra.mxu1 %v1517_v39  ;;  %v806_v39 = vld [vmem:[%s2114_s8 + $0x28] sm:$0xff] }
 0x107   :  { %1532 = vtanh.f32 %v597_v27  ;;  %v592_v29 = vadd.f32 %v591_v43, %v271_v13  ;;  %1386 = vmatprep.subr.mxu1 %v1519_v41  ;;  %v216_v13 = vpop.permute.xlu0 %215  ;;  %v808_v27 = vld [vmem:[%s2114_s8 + $0x38] sm:$0xff] }
 0x108   :  { %1387 = vmatpush3.msra.mxu1 %v1519_v41  ;;  %v537_v17 = vadd.f32 %v1999_v62, %v216_v13  ;;  %v639_v62 = vld [vmem:[%s2110_s4 + $0x38] sm:$0xff]  ;;  %v1619_v41 = vmov 0.0  }
 0x109   :  { %1534 = vtanh.f32 %v592_v29  ;;  %1388 = vmatprep.subr.mxu1 %v1521_v45  ;;  %1456 = vmatprep.subr.mxu0 %v1619_v41 }
 0x10a   :  { %1389 = vmatpush3.msra.mxu1 %v1521_v45  ;;  %1536 = vtanh.f32 %v587_v44  ;;  %1472 = vmatprep.mubr.msk.f32.mxu0 %vm1620_vm1, %v1619_v41  ;;  %v681_v45 = vpop.permute.xlu1 %680 }
 0x10b   :  { %1390 = vmatprep.subr.mxu1 %v1523_v48  ;;  %1538 = vtanh.f32 %v582_v47  ;;  %v206_v21 = vpop.permute.xlu0 %205 }
 0x10c   :  { %1391 = vmatpush3.msra.mxu1 %v1523_v48  ;;  %1540 = vtanh.f32 %v577_v49  ;;  %v527_v22 = vadd.f32 %v1995_v57, %v206_v21 }
 0x10d   :  { %1392 = vmatprep.subr.mxu1 %v1525_v50  ;;  %1542 = vtanh.f32 %v572_v52 }
 0x10e   :  { %1393 = vmatpush3.msra.mxu1 %v1525_v50  ;;  %1544 = vtanh.f32 %v567_v55  ;;  %v671_v50 = vpop.permute.xlu1 %670 }
 0x10f   :  { %1394 = vmatprep.subr.mxu1 %v1527_v53  ;;  %1546 = vtanh.f32 %v562_v58  ;;  %v686_v44 = vpop.permute.xlu0 %685 }
 0x110   :  { %1395 = vmatpush3.msra.mxu1 %v1527_v53  ;;  %1548 = vtanh.f32 %v557_v0 }
 0x111   :  { %1396 = vmatprep.subr.mxu1 %v1529_v56  ;;  %1550 = vtanh.f32 %v552_v7 }
 0x112   :  { %1397 = vmatpush3.msra.mxu1 %v1529_v56  ;;  %1552 = vtanh.f32 %v547_v10 }
 0x113   :  { %1398 = vmatprep.subr.mxu1 %v1531_v59  ;;  %1554 = vtanh.f32 %v542_v14  ;;  %v676_v48 = vpop.permute.xlu0 %675 }
 0x114   :  { %v1533_v3 = vpop.eup %1532  ;;  %1399 = vmatpush3.msra.mxu1 %v1531_v59  ;;  %1556 = vtanh.f32 %v537_v17  ;;  %v661_v59 = vpop.permute.xlu1 %660 }
 0x115   :  { %1401 = vmatmul.mubr.f32.vlgmr.msra.gmra.mxu1 %v633_v63  ;;  %1412 = vmatprep.subr.mxu1 %v1533_v3  ;;  %1558 = vtanh.f32 %v532_v19  ;;  %v970_v19 = vld [vmem:[%s2112_s6] sm:$0xf] }
 0x116   :  { %v1535_v8 = vpop.eup %1534  ;;  %1413 = vmatpush3.msra.mxu1 %v1533_v3  ;;  %1403 = vmatprep.mubr.f32.mxu1 %v634_v2  ;;  %1560 = vtanh.f32 %v527_v22 }
 0x117   :  { %1414 = vmatprep.subr.mxu1 %v1535_v8  ;;  %v1537_v12 = vpop.eup %1536  ;;  %1562 = vtanh.f32 %v522_v25  ;;  %v666_v56 = vpop.permute.xlu0 %665 }
 0x118   :  { %1415 = vmatpush3.msra.mxu1 %v1535_v8  ;;  %v1539_v15 = vpop.eup %1538  ;;  %v651_v3 = vpop.permute.xlu1 %650 }
 0x119   :  { %1404 = vmatmul.mubr.f32.gmra.mxu1 %v635_v9  ;;  %1416 = vmatprep.subr.mxu1 %v1537_v12  ;;  %v1541_v6 = vpop.eup %1540 }
 0x11a   :  { %1417 = vmatpush3.msra.mxu1 %v1537_v12  ;;  %1406 = vmatprep.mubr.f32.mxu1 %v636_v11  ;;  %v1543_v20 = vpop.eup %1542 }
 0x11b   :  { %1418 = vmatprep.subr.mxu1 %v1539_v15  ;;  %v1545_v1 = vpop.eup %1544  ;;  %v656_v0 = vpop.permute.xlu0 %655 }
 0x11c   :  { %1419 = vmatpush3.msra.mxu1 %v1539_v15  ;;  %v1547_v26 = vpop.eup %1546 }
 0x11d   :  { %1407 = vmatmul.mubr.f32.gmra.mxu1 %v637_v4  ;;  %1420 = vmatprep.subr.mxu1 %v1541_v6  ;;  %v1549_v57 = vpop.eup %1548  ;;  %v850_v4 = vpop.permute.xlu1 %849 }
 0x11e   :  { %1421 = vmatpush3.msra.mxu1 %v1541_v6  ;;  %1409 = vmatprep.mubr.f32.mxu1 %v638_v18  ;;  %v1551_v28 = vpop.eup %1550 }
 0x11f   :  { %1422 = vmatprep.subr.mxu1 %v1543_v20  ;;  %v1553_v30 = vpop.eup %1552  ;;  %v855_v14 = vpop.permute.xlu0 %854 }
 0x120   :  { %1423 = vmatpush3.msra.mxu1 %v1543_v20  ;;  %v1555_v33 = vpop.eup %1554 }
 0x121   :  { %1410 = vmatmul.mubr.f32.gmra.mxu1 %v639_v62  ;;  %1424 = vmatprep.subr.mxu1 %v1545_v1  ;;  %v1557_v60 = vpop.eup %1556  ;;  %v840_v22 = vpop.permute.xlu1 %839 }
 0x122   :  { %1425 = vmatpush3.msra.mxu1 %v1545_v1  ;;  %1444 = vmatprep.mubr.f32.mxu1 %v801_v23  ;;  %v1559_v34 = vpop.eup %1558 }
 0x123   :  { %1426 = vmatprep.subr.mxu1 %v1547_v26  ;;  %v1561_v35 = vpop.eup %1560  ;;  %v845_v21 = vpop.permute.xlu0 %844 }
 0x124   :  { %1427 = vmatpush3.msra.mxu1 %v1547_v26  ;;  %v1563_v31 = vpop.eup %1562 }
 0x125   :  { %1428 = vmatprep.subr.mxu1 %v1549_v57 }
 0x126   :  { %1429 = vmatpush3.msra.mxu1 %v1549_v57 }
 0x127   :  { %1430 = vmatprep.subr.mxu1 %v1551_v28  ;;  %v835_v57 = vpop.permute.xlu0 %834 }
 0x128   :  { %1431 = vmatpush3.msra.mxu1 %v1551_v28 }
 0x129   :  { %1432 = vmatprep.subr.mxu1 %v1553_v30 }
 0x12a   :  { %1433 = vmatpush3.msra.mxu1 %v1553_v30  ;;  %v830_v30 = vpop.permute.xlu1 %829 }
 0x12b   :  { %1434 = vmatprep.subr.mxu1 %v1555_v33 }
 0x12c   :  { %1435 = vmatpush3.msra.mxu1 %v1555_v33 }
 0x12d   :  { %1436 = vmatprep.subr.mxu1 %v1557_v60 }
 0x12e   :  { %1437 = vmatpush3.msra.mxu1 %v1557_v60 }
 0x12f   :  { %1438 = vmatprep.subr.mxu1 %v1559_v34 }
 0x130   :  { %1439 = vmatpush3.msra.mxu1 %v1559_v34  ;;  %v825_v34 = vpop.permute.xlu0 %824 }
 0x131   :  { %1440 = vmatprep.subr.mxu1 %v1561_v35 }
 0x132   :  { %1441 = vmatpush3.msra.mxu1 %v1561_v35 }
 0x133   :  { %1442 = vmatprep.subr.mxu1 %v1563_v31 }
 0x134   :  { %1443 = vmatpush3.msra.mxu1 %v1563_v31  ;;  %v820_v31 = vpop.permute.xlu1 %819 }
 0x135   :  { %1445 = vmatmul.mubr.f32.vlgmr.msra.gmra.mxu1 %v802_v36  ;;  %1475 = vmatprep.subr.mxu1 %v1619_v41 }
 0x136   :  { %1447 = vmatprep.mubr.f32.mxu1 %v803_v37 }
 0x139   :  { %1448 = vmatmul.mubr.f32.gmra.mxu1 %v804_v38 }
 0x13a   :  { %1450 = vmatprep.mubr.f32.mxu1 %v805_v32 }
 0x13d   :  { %1451 = vmatmul.mubr.f32.gmra.mxu1 %v806_v39 }
 0x13e   :  { %1453 = vmatprep.mubr.f32.mxu1 %v807_v40 }
 0x141   :  { %1454 = vmatmul.mubr.f32.gmra.mxu1 %v808_v27 }
 0x142   :  { %1491 = vmatprep.mubr.msk.f32.mxu1 %vm1620_vm1, %v1619_v41 }
 0x1d5   :  { %v1402_v42 = vpop.f32.mrf.mxu1 }
 0x1d6   :  { %v760_v2 = vadd.f32 %v1402_v42, %v656_v0 }
 0x1d7   :  { %v754_v43 = vpop.f32.mrf.mxu1 }
 0x1d8   :  { %v755_v5 = vadd.f32 %v754_v43, %v651_v3  ;;  %v1051_v43 = vld [vmem:[%s2116_s10] sm:$0x1] }
 0x1d9   :  { %v1405_v29 = vpop.f32.mrf.mxu1 }
 0x1da   :  { %v770_v61 = vadd.f32 %v1405_v29, %v666_v56  ;;  %v975_v29 = vpop.permute.xlu0 %974  ;;  %v1058_v56 = vlaneseq }
 0x1db   :  { %v764_v46 = vpop.f32.mrf.mxu1 }
 0x1dc   :  { %v765_v63 = vadd.f32 %v764_v46, %v661_v59  ;;  %v1059_v59 = vshrl.u32 %v1058_v56, 7 }
 0x1dd   :  { %v1408_v47 = vpop.f32.mrf.mxu1 }
 0x1de   :  { %v780_v54 = vadd.f32 %v1408_v47, %v676_v48 }
 0x1df   :  { %v774_v49 = vpop.f32.mrf.mxu1 }
 0x1e0   :  { %v775_v58 = vadd.f32 %v774_v49, %v671_v50 }
 0x1e1   :  { %v1411_v51 = vpop.f32.mrf.mxu1 }
 0x1e2   :  { %v790_v52 = vadd.f32 %v1411_v51, %v686_v44  ;;  %v1141_v51 = vpop.permute.xlu1 %1140 }
 0x1e3   :  { %v784_v53 = vpop.f32.mrf.mxu1 }
 0x1e4   :  { %1564 = vtanh.f32 %v790_v52  ;;  %v785_v55 = vadd.f32 %v784_v53, %v681_v45  ;;  %v53_v45 = vld [vmem:[%s2107_s1] sm:$0xf]  ;;  %s1621_s1 = smov [#allocation4]  }
 0x1e5   :  { %s1177_s10 = sshll.u32 %s1621_s1, 4  ;;  %s1178_s10 = int_to_ptr.vmem [resolvable:$true] %s1177_s10 }
 0x1e6   :  { %1566 = vtanh.f32 %v785_v55  ;;  %v1157_v3 = vpop.permute.xlu1 %1156  ;;  %s1596_s30 = scalar_lea.vmem %s1178_s10, 32  ;;  %p1601_p1 = scmp.lt.s32.totalorder %s1178_s10, %s1178_s10 }
 0x1e7   :  { %1568 = vtanh.f32 %v780_v54  ;;  %p1597_p0 = scmp.ne.s32.totalorder %s1178_s10, %s1596_s30  ;;  %p1602_p2 = scmp.lt.s32.totalorder %s1596_s30, %s1596_s30 }
 0x1e8   :  { %1570 = vtanh.f32 %v775_v58 }
 0x1e9   :  { %1572 = vtanh.f32 %v770_v61  ;;  %p1603_p3 = por %p1602_p2, %p1601_p1 }
 0x1ea   :  { %1574 = vtanh.f32 %v765_v63  ;;  %v1060_v63 = vsub.s32 0, %v1059_v59 }
 0x1eb   :  { %1576 = vtanh.f32 %v760_v2  ;;  %v1056_v2 = vpop.permute.xlu0 %1055  ;;  %p1604_p4 = pnand %p1603_p3, %p1597_p0 }
 0x1ec   :  { %1578 = vtanh.f32 %v755_v5  ;;  %v1061_v5 = vrot.slane %v1056_v2, %v1060_v63 }
 0x1f1   :  { %v1565_v7 = vpop.eup %1564 }
 0x1f2   :  { %1457 = vmatpush3.msra.mxu0 %v1565_v7 }
 0x1f3   :  { %v1567_v8 = vpop.eup %1566  ;;  %1458 = vmatprep.subr.mxu0 %v1619_v41 }
 0x1f4   :  { %1459 = vmatpush3.msra.mxu0 %v1567_v8  ;;  %v1569_v9 = vpop.eup %1568 }
 0x1f5   :  { %v1446_v10 = vpop.f32.mrf.mxu1  ;;  %1460 = vmatprep.subr.mxu0 %v1619_v41  ;;  %v1571_v11 = vpop.eup %1570 }
 0x1f6   :  { %1461 = vmatpush3.msra.mxu0 %v1569_v9  ;;  %v1573_v13 = vpop.eup %1572  ;;  %v929_v35 = vadd.f32 %v1446_v10, %v825_v34  ;;  %v1162_v9 = vrot.slane %v1157_v3, %v1060_v63 }
 0x1f7   :  { %v923_v12 = vpop.f32.mrf.mxu1  ;;  %1462 = vmatprep.subr.mxu0 %v1619_v41  ;;  %v1575_v16 = vpop.eup %1574 }
 0x1f8   :  { %1463 = vmatpush3.msra.mxu0 %v1571_v11  ;;  %v1577_v18 = vpop.eup %1576  ;;  %v924_v36 = vadd.f32 %v923_v12, %v820_v31 }
 0x1f9   :  { %v1449_v15 = vpop.f32.mrf.mxu1  ;;  %1464 = vmatprep.subr.mxu0 %v1619_v41  ;;  %v1579_v20 = vpop.eup %1578 }
 0x1fa   :  { %1465 = vmatpush3.msra.mxu0 %v1573_v13  ;;  %v939_v33 = vadd.f32 %v1449_v15, %v835_v57 }
 0x1fb   :  { %v933_v17 = vpop.f32.mrf.mxu1  ;;  %1466 = vmatprep.subr.mxu0 %v1619_v41 }
 0x1fc   :  { %1467 = vmatpush3.msra.mxu0 %v1575_v16  ;;  %v934_v60 = vadd.f32 %v933_v17, %v830_v30 }
 0x1fd   :  { %v1452_v6 = vpop.f32.mrf.mxu1  ;;  %1468 = vmatprep.subr.mxu0 %v1619_v41 }
 0x1fe   :  { %1469 = vmatpush3.msra.mxu0 %v1577_v18  ;;  %v949_v25 = vadd.f32 %v1452_v6, %v845_v21 }
 0x1ff   :  { %v943_v62 = vpop.f32.mrf.mxu1  ;;  %1470 = vmatprep.subr.mxu0 %v1619_v41 }
 0x200   :  { %1471 = vmatpush3.msra.mxu0 %v1579_v20  ;;  %v944_v28 = vadd.f32 %v943_v62, %v840_v22 }
 0x201   :  { %v1455_v23 = vpop.f32.mrf.mxu1  ;;  %1473 = vmatmul.mubr.msk.f32.vlgmr.msra.gmra.mxu0 %vm977_vm2, %v970_v19 }
 0x202   :  { %v959_v1 = vadd.f32 %v1455_v23, %v855_v14 }
 0x203   :  { %v953_v24 = vpop.f32.mrf.mxu1 }
 0x204   :  { %1580 = vtanh.f32 %v959_v1  ;;  %v954_v26 = vadd.f32 %v953_v24, %v850_v4 }
 0x206   :  { %1582 = vtanh.f32 %v954_v26 }
 0x207   :  { %1584 = vtanh.f32 %v949_v25 }
 0x208   :  { %1586 = vtanh.f32 %v944_v28 }
 0x209   :  { %1588 = vtanh.f32 %v939_v33 }
 0x20a   :  { %1590 = vtanh.f32 %v934_v60 }
 0x20b   :  { %1592 = vtanh.f32 %v929_v35 }
 0x20c   :  { %1594 = vtanh.f32 %v924_v36 }
 0x211   :  { %v1581_v37 = vpop.eup %1580 }
 0x212   :  { %1476 = vmatpush3.msra.mxu1 %v1581_v37 }
 0x213   :  { %v1583_v38 = vpop.eup %1582  ;;  %1477 = vmatprep.subr.mxu1 %v1619_v41 }
 0x214   :  { %1478 = vmatpush3.msra.mxu1 %v1583_v38  ;;  %v1585_v32 = vpop.eup %1584 }
 0x215   :  { %1479 = vmatprep.subr.mxu1 %v1619_v41  ;;  %v1587_v39 = vpop.eup %1586 }
 0x216   :  { %1480 = vmatpush3.msra.mxu1 %v1585_v32  ;;  %v1589_v40 = vpop.eup %1588 }
 0x217   :  { %1481 = vmatprep.subr.mxu1 %v1619_v41  ;;  %v1591_v27 = vpop.eup %1590 }
 0x218   :  { %1482 = vmatpush3.msra.mxu1 %v1587_v39  ;;  %v1593_v42 = vpop.eup %1592 }
 0x219   :  { %1483 = vmatprep.subr.mxu1 %v1619_v41  ;;  %v1595_v44 = vpop.eup %1594 }
 0x21a   :  { %1484 = vmatpush3.msra.mxu1 %v1589_v40 }
 0x21b   :  { %1485 = vmatprep.subr.mxu1 %v1619_v41 }
 0x21c   :  { %1486 = vmatpush3.msra.mxu1 %v1591_v27 }
 0x21d   :  { %1487 = vmatprep.subr.mxu1 %v1619_v41 }
 0x21e   :  { %1488 = vmatpush3.msra.mxu1 %v1593_v42 }
 0x21f   :  { %1489 = vmatprep.subr.mxu1 %v1619_v41 }
 0x220   :  { %1490 = vmatpush3.msra.mxu1 %v1595_v44 }
 0x221   :  { %1492 = vmatmul.mubr.msk.f32.vlgmr.msra.gmra.mxu1 %vm977_vm2, %v1051_v43 }
 0x2c1   :  { %v1047_v46 = vpop.f32.mrf.mxu0 }
 0x2c2   :  { %v1048_v47 = vadd.f32 %v1047_v46, %v975_v29 }
 0x2c3   :  { %v1474_v48 = vpop.f32.mrf.mxu0 }
 0x2c4   :  { %v1135_v49 = vsub.f32 %v53_v45, %v1048_v47 }
 0x2c6   :  { %v1136_v50 = vmul.f32 %v1135_v49, %v1135_v49 }
 0x2c8   :  { %v1143_v52 = vmul.f32 %v1141_v51, %v1136_v50 }
 0x2ca   :  { %v1145_v53 = vsel %vm1144_vm3, %v1143_v52, 0.0 }
 0x2cb   :  { %v1146_v54 = vrot.slane %v1145_v53, 4 }
 0x2cd   :  { %v1147_v55 = vadd.f32 %v1146_v54, %v1145_v53 }
 0x2cf   :  { %v1148_v41 = vrot.slane %v1147_v55, 2 }
 0x2d1   :  { %v1149_v58 = vadd.f32 %v1148_v41, %v1147_v55 }
 0x2d3   :  { %v1150_v61 = vrot.slane %v1149_v58, 1 }
 0x2d5   :  { %v1151_v0 = vadd.f32 %v1150_v61, %v1149_v58 }
 0x2d7   :  { %v1153_v7 = vmul.f32 0.5, %v1151_v0 }
 0x2d9   :  { %v1163_v13 = vsub.f32 %v1162_v9, %v1153_v7 }
 0x2e1   :  { %v1131_v8 = vpop.f32.mrf.mxu1 }
 0x2e2   :  { %v1132_v10 = vadd.f32 %v1131_v8, %v1061_v5 }
 0x2e3   :  { %v1493_v11 = vpop.f32.mrf.mxu1 }
 0x2e4   :  { %v1165_v12 = vrot.slane %v1132_v10, 7 }
 0x2e6   :  { %v1168_v14 = vsel %vm1167_vm4, %v1163_v13, %v1165_v12 }
 0x2e7   :  { %1170 = vst.msk [vmem:[#allocation4] sm:$0x3] %vm1169_vm5, %v1168_v14 }
 0x2e8   :  { %1607 = shalt.err (!%p1604_p4)
}
 0x2e9   :  { %1180 = dma.vmem_to_hbm [thread:$0]  %s1178_s10, 32, %s2119_s14, [#allocation5]  }
 0x2ea   :  { %1616 = dma.done.wait [#allocation5], 32  }
 0x2eb   :  { %1617 = vsyncadd [#allocation5], 4294967264 }
 0x2ec   :  { %1184 = vsyncpa [#allocation5], 1 }

</bundles_post_ra>
